<compile_context>
chip_gen: v7x
topology: tpu7x:2x2x1
jax: 0.10.0
libtpu: 0.0.40
codegen_flags: <defaults>
</compile_context>

<pallas_src>
import functools

import jax
import jax.numpy as jnp
from jax.experimental import pallas as pl
from jax.experimental.pallas import tpu as pltpu


def _round_up(x: int, m: int) -> int:
    return ((x + m - 1) // m) * m


def _cdiv(a: int, b: int) -> int:
    return -(-a // b)


def mask_nxm(w_abs: jnp.ndarray, sparse_n: int, sparse_m: int) -> jnp.ndarray:
    """N:M mask: in every contiguous group of `sparse_n` weights along in_features,
    keep the `sparse_m` largest-magnitude entries (pure JAX, done once at init).
    NOTE: tie-breaking on exactly-equal magnitudes may differ from torch.topk."""
    out_f, in_f = w_abs.shape
    assert in_f % sparse_n == 0
    groups = w_abs.reshape(out_f, in_f // sparse_n, sparse_n)
    order = jnp.argsort(-groups, axis=-1)          # descending by magnitude
    ranks = jnp.argsort(order, axis=-1)            # rank of each element in its group
    mask = (ranks < sparse_m).astype(w_abs.dtype)
    return mask.reshape(out_f, in_f)


# ----------------------------- kernels ---------------------------------------

def _mfc_kernel_f32out(x_ref, w_ref, b_ref, o_ref):
    """f32 output: accumulate directly into the (VMEM-resident) output block.
    Bias is folded into the k==0 init, so there is no epilogue work at all."""
    k = pl.program_id(2)

    @pl.when(k == 0)
    def _init():
        o_ref[...] = jnp.broadcast_to(b_ref[...], o_ref.shape)

    o_ref[...] += jnp.dot(x_ref[...], w_ref[...],
                          preferred_element_type=jnp.float32)


def _mfc_kernel_acc(x_ref, w_ref, b_ref, o_ref, acc_ref):
    """Non-f32 output: f32 VMEM scratch accumulator, cast-only epilogue."""
    k = pl.program_id(2)

    @pl.when(k == 0)
    def _init():
        acc_ref[...] = jnp.broadcast_to(b_ref[...], acc_ref.shape)

    acc_ref[...] += jnp.dot(x_ref[...], w_ref[...],
                            preferred_element_type=jnp.float32)

    @pl.when(k == pl.num_programs(2) - 1)
    def _finalize():
        o_ref[...] = acc_ref[...].astype(o_ref.dtype)


# ----------------------------- tiling helpers --------------------------------

def _pick_lane_tile(dim: int, max_tile: int) -> int:
    """Tile width for a lane/contraction dim: 128-aligned, preferring 256 alignment
    (v6e/v7x MXU is 256 wide), clamped to the padded problem size."""
    padded = _round_up(dim, 128)
    if padded <= 128:
        return padded
    if padded % 256 != 0 and _round_up(dim, 256) <= max_tile:
        padded = _round_up(dim, 256)
    return min(max_tile, padded)


def _pick_row_tile(m_rows: int, max_tile: int) -> int:
    """Row tile (8-aligned) chosen so padded M splits evenly across its blocks."""
    blocks = _cdiv(m_rows, max_tile)
    return min(max_tile, _round_up(_cdiv(m_rows, blocks), 8))


# ----------------------------- one-time weight prep --------------------------

def prepare_masked_fc_params(weight, mask, bias=None, *, tk=1024, tn=512,
                             compute_dtype=jnp.bfloat16):
    """One-time (module-init) preparation: fold the static mask, transpose to (K, N),
    pad to the tile grid, and cast to the MXU compute dtype. The per-call forward
    then only streams this already-prepared weight (no per-call K*N HBM passes)."""
    out_f, in_f = weight.shape
    tk_ = _pick_lane_tile(in_f, tk)
    tn_ = _pick_lane_tile(out_f, tn)
    kp = _round_up(in_f, tk_)
    np_ = _round_up(out_f, tn_)

    w_t = (weight * mask).T.astype(compute_dtype)                    # (K, N), masked
    w_prep = jnp.pad(w_t, ((0, kp - in_f), (0, np_ - out_f)))

    b = jnp.zeros((out_f,), jnp.float32) if bias is None else bias.astype(jnp.float32)
    b_prep = jnp.pad(b, (0, np_ - out_f)).reshape(1, np_)

    return w_prep, b_prep, dict(out_features=out_f, tk=tk_, tn=tn_)


# ----------------------------- forward ---------------------------------------

@functools.partial(jax.jit,
                   static_argnames=("out_features", "tk", "tn", "tm", "compute_dtype"))
def masked_fc_forward(x, w_prep, b_prep, *, out_features, tk, tn, tm=512,
                      compute_dtype=jnp.bfloat16):
    """y = x @ W_masked.T + bias using the pre-prepared (K, N) weight."""
    *lead, in_f = x.shape
    kp, np_ = w_prep.shape
    assert kp % tk == 0 and np_ % tn == 0 and kp >= in_f and np_ >= out_features

    xm = x.reshape(-1, in_f).astype(compute_dtype)
    m_rows = xm.shape[0]

    tm_ = _pick_row_tile(m_rows, tm)
    mp = _round_up(m_rows, tm_)
    xp = jnp.pad(xm, ((0, mp - m_rows), (0, kp - in_f)))

    # v7x megacore: guarantee >= 2 blocks along a "parallel" axis when possible.
    tn_ = tn
    if (mp // tm_) == 1 and (np_ // tn_) == 1 and tn_ >= 256 \
            and (tn_ // 2) % 128 == 0 and np_ % (tn_ // 2) == 0:
        tn_ //= 2

    grid = (mp // tm_, np_ // tn_, kp // tk)

    out_dtype = x.dtype
    f32_out = (out_dtype == jnp.float32)
    kernel = _mfc_kernel_f32out if f32_out else _mfc_kernel_acc
    scratch = [] if f32_out else [pltpu.VMEM((tm_, tn_), jnp.float32)]

    # VMEM budget: double-buffered x / W / out tiles (+ scratch accumulator).
    itm = jnp.dtype(compute_dtype).itemsize
    oitm = jnp.dtype(out_dtype).itemsize
    est = (2 * tm_ * tk * itm + 2 * tk * tn_ * itm + 2 * tm_ * tn_ * oitm
           + (0 if f32_out else tm_ * tn_ * 4) + 2 * tn_ * 4)
    vmem_limit = int(max(32 << 20, est + (8 << 20)))

    out = pl.pallas_call(
        kernel,
        out_shape=jax.ShapeDtypeStruct((mp, np_), out_dtype),
        grid_spec=pltpu.PrefetchScalarGridSpec(
            num_scalar_prefetch=0,
            grid=grid,
            in_specs=[
                pl.BlockSpec((tm_, tk), lambda i, j, k: (i, k)),   # activations (bf16)
                pl.BlockSpec((tk, tn_), lambda i, j, k: (k, j)),   # masked W^T (bf16)
                pl.BlockSpec((1, tn_), lambda i, j, k: (0, j)),    # bias (f32)
            ],
            out_specs=pl.BlockSpec((tm_, tn_), lambda i, j, k: (i, j)),
            scratch_shapes=scratch,
        ),
        compiler_params=pltpu.CompilerParams(
            # K is the reduction (output block revisited) -> "arbitrary";
            # M/N independent -> "parallel" (shards across v7x's 2 TCs).
            dimension_semantics=("parallel", "parallel", "arbitrary"),
            vmem_limit_bytes=vmem_limit,
        ),
    )(xp, w_prep, b_prep)

    return out[:m_rows, :out_features].reshape(*lead, out_features)


def masked_fully_connected(x, weight, mask, bias=None, *, tm=512, tn=512, tk=1024):
    """Convenience one-call API. For repeated forwards, call prepare_masked_fc_params
    once and masked_fc_forward per call (avoids per-call weight prep traffic)."""
    w_prep, b_prep, meta = prepare_masked_fc_params(weight, mask, bias, tk=tk, tn=tn)
    return masked_fc_forward(x, w_prep, b_prep, tm=tm, **meta)


if __name__ == "__main__":
    # Deterministic synthetic "parameters" (small shapes consistent with the module).
    batch, seq = 2, 8
    in_features, out_features = 32, 64
    sparse_n, sparse_m = 4, 2

    key = jax.random.PRNGKey(0)
    k_w, k_b, k_x = jax.random.split(key, 3)
    weight = jax.random.normal(k_w, (out_features, in_features), jnp.float32)
    bias = jax.random.normal(k_b, (out_features,), jnp.float32)
    x = jax.random.normal(k_x, (batch, seq, in_features), jnp.float32)

    # "module init": static N:M mask from |W|; fold/transpose/pad/cast the weight ONCE.
    mask = mask_nxm(jnp.abs(weight), sparse_n, sparse_m)
    w_prep, b_prep, meta = prepare_masked_fc_params(weight, mask, bias)

    # forward (f32 activations -> direct-accumulate kernel variant)
    y = masked_fc_forward(x, w_prep, b_prep, **meta)
    y = jax.block_until_ready(y)

    # Reference check against plain-JAX F.linear semantics (bf16 operand feed, so
    # tolerance is loosened accordingly; accumulation is f32).
    ref = x @ (weight * mask).T + bias
    assert y.shape == (batch, seq, out_features)
    assert jnp.allclose(y, ref, atol=5e-2, rtol=5e-2), float(jnp.max(jnp.abs(y - ref)))

    # Also exercise the scratch-accumulator variant (non-f32 activations/output).
    y_bf16 = masked_fc_forward(x.astype(jnp.bfloat16), w_prep, b_prep, **meta)
    y_bf16 = jax.block_until_ready(y_bf16)
    assert y_bf16.shape == (batch, seq, out_features)
    assert jnp.allclose(y_bf16.astype(jnp.float32), ref, atol=1e-1, rtol=1e-1)

    print("KERNEL_OK")
</pallas_src>

<mosaic_0001>
module attributes {stable_mosaic.version = 11 : i64} {
  func.func @_mfc_kernel_f32out(%arg0: i32, %arg1: i32, %arg2: i32, %arg3: memref<16x128xbf16, #tpu.memory_space<vmem>>, %arg4: memref<128x128xbf16, #tpu.memory_space<vmem>>, %arg5: memref<1x128xf32, #tpu.memory_space<vmem>>, %arg6: memref<16x128xf32, #tpu.memory_space<vmem>>) attributes {dimension_semantics = [#tpu.dimension_semantics<parallel>, #tpu.dimension_semantics<parallel>, #tpu.dimension_semantics<arbitrary>], iteration_bounds = array<i64: 1, 1, 1>, scalar_prefetch = 0 : i64, scratch_operands = 0 : i64, tpu.core_type = #tpu.core_type<tc>, window_params = [{transform_indices = @transform_0, window_bounds = array<i64: 16, 128>}, {transform_indices = @transform_1, window_bounds = array<i64: 128, 128>}, {transform_indices = @transform_2, window_bounds = array<i64: 1, 128>}, {transform_indices = @transform_3, window_bounds = array<i64: 16, 128>}]} {
    %c0_i32 = arith.constant 0 : i32
    %0 = arith.cmpi eq, %arg2, %c0_i32 : i32
    %1 = arith.extui %0 : i1 to i32
    %c0_i32_0 = arith.constant 0 : i32
    %2 = arith.cmpi ne, %1, %c0_i32_0 : i32
    scf.if %2 {
      %c0_8 = arith.constant 0 : index
      %c0_9 = arith.constant 0 : index
      %9 = vector.load %arg5[%c0_8, %c0_9] : memref<1x128xf32, #tpu.memory_space<vmem>>, vector<1x128xf32>
      %10 = vector.shape_cast %9 : vector<1x128xf32> to vector<1x128xf32>
      %11 = vector.broadcast %10 : vector<1x128xf32> to vector<16x128xf32>
      %c0_10 = arith.constant 0 : index
      %c0_11 = arith.constant 0 : index
      %12 = vector.load %arg6[%c0_10, %c0_11] : memref<16x128xf32, #tpu.memory_space<vmem>>, vector<16x128xf32>
      tpu.vector_store %arg6[%c0_10, %c0_11], %11 {strides = array<i32>} : memref<16x128xf32, #tpu.memory_space<vmem>>, vector<16x128xf32>,
    } else {
    }
    %c0 = arith.constant 0 : index
    %c0_1 = arith.constant 0 : index
    %3 = vector.load %arg6[%c0, %c0_1] : memref<16x128xf32, #tpu.memory_space<vmem>>, vector<16x128xf32>
    %c0_2 = arith.constant 0 : index
    %c0_3 = arith.constant 0 : index
    %4 = vector.load %arg3[%c0_2, %c0_3] : memref<16x128xbf16, #tpu.memory_space<vmem>>, vector<16x128xbf16>
    %c0_4 = arith.constant 0 : index
    %c0_5 = arith.constant 0 : index
    %5 = vector.load %arg4[%c0_4, %c0_5] : memref<128x128xbf16, #tpu.memory_space<vmem>>, vector<128x128xbf16>
    %cst = arith.constant dense<0.000000e+00> : vector<16x128xf32>
    %6 = tpu.matmul %4, %5, %cst {dimension_numbers = #tpu.dot_dimension_numbers<[1], [0], [0], [1], [0, 0, 1, 1], [], []>} : vector<16x128xbf16>, vector<128x128xbf16>, vector<16x128xf32> -> vector<16x128xf32>
    %7 = arith.addf %3, %6 : vector<16x128xf32>
    %c0_6 = arith.constant 0 : index
    %c0_7 = arith.constant 0 : index
    %8 = vector.load %arg6[%c0_6, %c0_7] : memref<16x128xf32, #tpu.memory_space<vmem>>, vector<16x128xf32>
    tpu.vector_store %arg6[%c0_6, %c0_7], %7 {strides = array<i32>} : memref<16x128xf32, #tpu.memory_space<vmem>>, vector<16x128xf32>,
    return
  }
  func.func @transform_0(%arg0: i32, %arg1: i32, %arg2: i32) -> (i32, i32) {
    %c0_i32 = arith.constant 0 : i32
    return %arg0, %arg2 : i32, i32
  }
  func.func @transform_1(%arg0: i32, %arg1: i32, %arg2: i32) -> (i32, i32) {
    %c0_i32 = arith.constant 0 : i32
    return %arg2, %arg1 : i32, i32
  }
  func.func @transform_2(%arg0: i32, %arg1: i32, %arg2: i32) -> (i32, i32) {
    %c0_i32 = arith.constant 0 : i32
    %c0_i32_0 = arith.constant 0 : i32
    return %c0_i32, %arg1 : i32, i32
  }
  func.func @transform_3(%arg0: i32, %arg1: i32, %arg2: i32) -> (i32, i32) {
    %c0_i32 = arith.constant 0 : i32
    return %arg0, %arg1 : i32, i32
  }
}

</mosaic_0001>

<bundles_post_ra>
// kernel: masked_fc_forward.1
= control target key start
LH: loop header
LB: loop body
LE: loop exit
PB: predicated region body
PF: predicated region fallthrough
CT: control target
= control target key end

     0   :  { %8 = vsyncpa [#allocation3], 0  ;;  %s243_s12 = smov [#allocation2]   ;;  %s292_s0 = inlined_call_operand.vmem [shape: bf16[16,128], index: 0, kind: input, shape index: {}]   ;;  %s293_s1 = inlined_call_operand.hbm [shape: bf16[128,128], index: 1, kind: input, shape index: {}]   ;;  %s294_s2 = inlined_call_operand.vmem [shape: f32[1,128], index: 2, kind: input, shape index: {}]   ;;  %s295_s3 = inlined_call_operand.vmem [shape: f32[16,128], index: 3, kind: output, shape index: {}]  }
   0x1   :  { %s16_s13 = sshll.u32 %s243_s12, 4  ;;  %s219_s16 = scalar_lea.hbm %s293_s1, 1024  ;;  %s17_s13 = int_to_ptr.vmem [resolvable:$true] %s16_s13 }
   0x2   :  { %p220_p0 = scmp.ne.s32.totalorder %s293_s1, %s219_s16  ;;  %p223_p1 = scmp.lt.u32.totalorder %s219_s16, %s293_s1 }
   0x4   :  { %p225_p2 = pnand %p223_p1, %p220_p0 }
   0x6   :  { %228 = shalt.err (!%p225_p2)
}
   0x7   :  { %s229_s21 = scalar_lea.vmem %s17_s13, 1024  ;;  %p234_p4 = scmp.lt.s32.totalorder %s17_s13, %s17_s13 }
   0x8   :  { %p230_p3 = scmp.ne.s32.totalorder %s17_s13, %s229_s21  ;;  %p235_p5 = scmp.lt.s32.totalorder %s229_s21, %s229_s21 }
   0xa   :  { %p236_p6 = por %p235_p5, %p234_p4 }
   0xc   :  { %p237_p7 = pnand %p236_p6, %p230_p3 }
   0xe   :  { %240 = shalt.err (!%p237_p7)
}
   0xf   :  { %s244_s22 = smov 64   ;;  %s245_s23 = smov 4  }
  0x10   :  { %22 = dma.hbm_to_vmem [thread:$0]  %s293_s1, 1024, %s17_s13, [#allocation3], %s244_s22, %s244_s22, %s245_s23  }
  0x11   :  { %241 = dma.done.wait [#allocation3], 1024  }
  0x12   :  { %242 = vsyncadd [#allocation3], 4294966272  ;;  %v246_v0 = vmov 0.0   ;;  %vm247_vm0 = vmmov 0   ;;  %v210_v1 = vld [vmem:[#allocation2] sm:$0xff]   ;;  %v211_v2 = vld [vmem:[#allocation2 + $0x8] sm:$0xff]  }
  0x13   :  { %185 = vmatprep.subr.bf16.mxu0 %v246_v0  ;;  %201 = vmatprep.mubr.msk.bf16.mxu0 %vm247_vm0, %v246_v0  ;;  %v212_v3 = vld [vmem:[#allocation2 + $0x10] sm:$0xff]   ;;  %v213_v4 = vld [vmem:[#allocation2 + $0x18] sm:$0xff]   ;;  %v214_v5 = vld [vmem:[#allocation2 + $0x20] sm:$0xff]  }
  0x14   :  { %186 = vmatpush3.bf16.msra.mxu0 %v210_v1  ;;  %v215_v6 = vld [vmem:[#allocation2 + $0x28] sm:$0xff]   ;;  %v216_v7 = vld [vmem:[#allocation2 + $0x30] sm:$0xff]   ;;  %v217_v8 = vld [vmem:[#allocation2 + $0x38] sm:$0xff]  }
  0x15   :  { %187 = vmatprep.subr.bf16.mxu0 %v246_v0  ;;  %v218_v9 = vld [vmem:[%s292_s0] sm:$0xff]  }
  0x16   :  { %v166_v10 = vld [vmem:[%s294_s2] ss:$0 sm:$0xff] }
  0x18   :  { %188 = vmatpush3.bf16.msra.mxu0 %v211_v2 }
  0x19   :  { %189 = vmatprep.subr.bf16.mxu0 %v246_v0 }
  0x1c   :  { %190 = vmatpush3.bf16.msra.mxu0 %v212_v3 }
  0x1d   :  { %191 = vmatprep.subr.bf16.mxu0 %v246_v0 }
  0x20   :  { %192 = vmatpush3.bf16.msra.mxu0 %v213_v4 }
  0x21   :  { %193 = vmatprep.subr.bf16.mxu0 %v246_v0 }
  0x24   :  { %194 = vmatpush3.bf16.msra.mxu0 %v214_v5 }
  0x25   :  { %195 = vmatprep.subr.bf16.mxu0 %v246_v0 }
  0x28   :  { %196 = vmatpush3.bf16.msra.mxu0 %v215_v6 }
  0x29   :  { %197 = vmatprep.subr.bf16.mxu0 %v246_v0 }
  0x2c   :  { %198 = vmatpush3.bf16.msra.mxu0 %v216_v7 }
  0x2d   :  { %199 = vmatprep.subr.bf16.mxu0 %v246_v0 }
  0x30   :  { %200 = vmatpush3.bf16.msra.mxu0 %v217_v8 }
  0x33   :  { %202 = vmatmul.mubr.bf16.vlgmr.msra.gmra.mrb[0].mxu0 %v218_v9 }
 0x106   :  { %v150_v11 = vpop.f32.mrb[0].mxu0 }
 0x107   :  { %v157_v12 = vadd.f32 %v166_v10, %v150_v11  ;;  %v203_v13 = vpop.f32.mrb[1].mxu0 }
 0x108   :  { %v153_v14 = vpop.f32.mrb[2].mxu0 }
 0x109   :  { %159 = vst [vmem:[%s295_s3] sm:$0xff] %v157_v12  ;;  %v158_v15 = vadd.f32 %v166_v10, %v153_v14  ;;  %v204_v16 = vpop.f32.mrb[3].mxu0 }
 0x10b   :  { %160 = vst [vmem:[%s295_s3 + $0x8] sm:$0xff] %v158_v15 }
 0x10c   :  { %165 = vsyncpa [#allocation3], 1 }

</bundles_post_ra>
